<compile_context>
chip_gen: v7x
topology: tpu7x:2x2x1
jax: 0.10.0
libtpu: 0.0.40
codegen_flags: <defaults>
</compile_context>

<pallas_src>
import jax
import jax.numpy as jnp
from jax.experimental import pallas as pl
from jax.experimental.pallas import tpu as pltpu

LANE = 128      # lane width; use 256 for best MXU utilization on v6e/v7x
SUBLANE = 8     # f32 sublane count
TILE_V = 128    # vocab tile; raise to 512-2048 for large vocab (halve on v7x: 64 MiB VMEM)


def round_up(x, m):
    return (x + m - 1) // m * m


# ----------------------------------------------------------------------------
# Kernel: one grid step = (vocab-tile v, time-step t).
# Hidden recurrence is recomputed per vocab tile (cheap vs. the V projection),
# which keeps the V axis embarrassingly parallel (v7x megacore).
# ----------------------------------------------------------------------------
def gru_seq_kernel(x_ref, h0_ref, wi_ref, whrz_ref, bhrz_ref,
                   whh_ref, bhh_ref, who_ref, bho_ref,
                   logits_ref, hfinal_ref, h_scr):
    t = pl.program_id(1)

    @pl.when(t == 0)
    def _():
        h_scr[...] = h0_ref[...]

    HP = h_scr.shape[1]

    h = h_scr[...]                                  # f32 (B, HP) — elementwise path stays f32
    h_bf = h.astype(jnp.bfloat16)
    x_bf = x_ref[0]                                 # (B, EP) bf16 embedding row block

    # fused input projection: (B, EP) @ (EP, 3*HP) -> [r | z | h]
    xi = jnp.dot(x_bf, wi_ref[...], preferred_element_type=jnp.float32)
    # fused hidden r/z projection: (B, HP) @ (HP, 2*HP) -> [r | z]
    hrz = jnp.dot(h_bf, whrz_ref[...], preferred_element_type=jnp.float32) + bhrz_ref[...]

    gate = jax.nn.sigmoid(xi[:, 0:HP] + hrz[:, 0:HP])                # i2r + h2r
    rate = jax.nn.sigmoid(xi[:, HP:2 * HP] + hrz[:, HP:2 * HP])      # i2z + h2z

    gh = (gate * h).astype(jnp.bfloat16)
    h_hat = jnp.tanh(xi[:, 2 * HP:3 * HP]
                     + jnp.dot(gh, whh_ref[...], preferred_element_type=jnp.float32)
                     + bhh_ref[...])

    h_new = (1.0 - rate) * h + rate * h_hat
    h_scr[...] = h_new

    # output projection for this lane-dense V tile
    logits_ref[0] = (jnp.dot(h_new.astype(jnp.bfloat16), who_ref[...],
                             preferred_element_type=jnp.float32)
                     + bho_ref[...]).astype(logits_ref.dtype)

    @pl.when(t == pl.num_programs(1) - 1)
    def _():
        hfinal_ref[0] = h_new


# ----------------------------------------------------------------------------
# One-time parameter packing (NOT per forward call): transpose, fuse, pad, bf16.
# ----------------------------------------------------------------------------
def pack_params(params, *, tile_v=TILE_V, lane=LANE):
    H, E = params["w_i2h"].shape
    V = params["w_h2o"].shape[0]
    EP, HP = round_up(E, lane), round_up(H, lane)
    VP = round_up(V, tile_v)

    def pad2(a, rows, cols):
        return jnp.zeros((rows, cols), a.dtype).at[:a.shape[0], :a.shape[1]].set(a)

    def pad1(a, n):
        return jnp.zeros((n,), a.dtype).at[:a.shape[0]].set(a)

    w_i = jnp.concatenate(
        [pad2(params["w_i2r"].T, EP, HP),
         pad2(params["w_i2z"].T, EP, HP),
         pad2(params["w_i2h"].T, EP, HP)], axis=1).astype(jnp.bfloat16)

    w_h_rz = jnp.concatenate(
        [pad2(params["w_h2r"].T, HP, HP),
         pad2(params["w_h2z"].T, HP, HP)], axis=1).astype(jnp.bfloat16)
    b_h_rz = jnp.concatenate(
        [pad1(params["b_h2r"], HP),
         pad1(params["b_h2z"], HP)]).reshape(1, 2 * HP).astype(jnp.float32)

    w_h2h = pad2(params["w_h2h"].T, HP, HP).astype(jnp.bfloat16)
    b_h2h = pad1(params["b_h2h"], HP).reshape(1, HP).astype(jnp.float32)

    w_h2o = pad2(params["w_h2o"].T, HP, VP).astype(jnp.bfloat16)
    b_h2o = pad1(params["b_h2o"], VP).reshape(1, VP).astype(jnp.float32)

    emb = pad2(params["embeddings"], params["embeddings"].shape[0], EP).astype(jnp.bfloat16)

    return dict(emb=emb, w_i=w_i, w_h_rz=w_h_rz, b_h_rz=b_h_rz,
                w_h2h=w_h2h, b_h2h=b_h2h, w_h2o=w_h2o, b_h2o=b_h2o,
                dims=dict(E=E, H=H, V=V, EP=EP, HP=HP, VP=VP, tile_v=tile_v))


# ----------------------------------------------------------------------------
# Wrapper factory: builds a jitted sequence forward + a single-step forward.
# ----------------------------------------------------------------------------
def make_rnn_forward(packed):
    d = packed["dims"]
    H, V = d["H"], d["V"]
    EP, HP, VP, tile_v = d["EP"], d["HP"], d["VP"], d["tile_v"]
    NV = VP // tile_v

    emb = packed["emb"]
    weights = (packed["w_i"], packed["w_h_rz"], packed["b_h_rz"],
               packed["w_h2h"], packed["b_h2h"], packed["w_h2o"], packed["b_h2o"])

    @jax.jit
    def forward_seq(tokens, hidden):
        """tokens: int32 (T, B); hidden: f32 (B, H) -> (logits (T,B,V), h_final (B,H))."""
        tokens = jnp.asarray(tokens, jnp.int32)
        T, B = tokens.shape
        BP = round_up(max(B, SUBLANE), SUBLANE)

        tok_p = jnp.zeros((T, BP), jnp.int32).at[:, :B].set(tokens)
        h0_p = jnp.zeros((BP, HP), jnp.float32).at[:B, :H].set(hidden.astype(jnp.float32))

        # Whole-sequence embedding gather once (amortized over all T steps).
        # TODO(synk): for B==1, fuse this per-step via PrefetchScalarGridSpec +
        # an Element row-gather BlockSpec on the embedding table.
        x_seq = jnp.take(emb, tok_p, axis=0)                 # (T, BP, EP) bf16

        logits_p, h_p = pl.pallas_call(
            gru_seq_kernel,
            out_shape=(
                jax.ShapeDtypeStruct((T, BP, VP), jnp.float32),
                jax.ShapeDtypeStruct((NV, BP, HP), jnp.float32),
            ),
            grid_spec=pltpu.PrefetchScalarGridSpec(
                num_scalar_prefetch=0,
                grid=(NV, T),                                # V tiles outer (parallel), time inner
                in_specs=[
                    pl.BlockSpec((1, BP, EP), lambda v, t: (t, 0, 0)),      # x_seq (per step)
                    pl.BlockSpec((BP, HP), lambda v, t: (0, 0)),            # h0 (resident)
                    pl.BlockSpec((EP, 3 * HP), lambda v, t: (0, 0)),        # fused W_i (resident)
                    pl.BlockSpec((HP, 2 * HP), lambda v, t: (0, 0)),        # fused W_h_rz (resident)
                    pl.BlockSpec((1, 2 * HP), lambda v, t: (0, 0)),         # fused b_h_rz
                    pl.BlockSpec((HP, HP), lambda v, t: (0, 0)),            # W_h2h (resident)
                    pl.BlockSpec((1, HP), lambda v, t: (0, 0)),             # b_h2h
                    pl.BlockSpec((HP, tile_v), lambda v, t: (0, v)),        # W_h2o V-tile
                    pl.BlockSpec((1, tile_v), lambda v, t: (0, v)),         # b_h2o V-tile
                ],
                out_specs=(
                    pl.BlockSpec((1, BP, tile_v), lambda v, t: (t, 0, v)),  # lane-dense logits
                    pl.BlockSpec((1, BP, HP), lambda v, t: (v, 0, 0)),      # final hidden (per v)
                ),
                scratch_shapes=[pltpu.VMEM((BP, HP), jnp.float32)],          # resident hidden state
            ),
            compiler_params=pltpu.CompilerParams(
                dimension_semantics=("parallel", "arbitrary"),
                vmem_limit_bytes=48 * 1024 * 1024,           # fits v7x's 64 MiB VMEM with headroom
            ),
        )(x_seq, h0_p, *weights)

        return logits_p[:, :B, :V], h_p[0, :B, :H]

    def forward_step(token_ids, hidden):
        """Single-step API matching the PyTorch module's forward()."""
        logits, h_new = forward_seq(token_ids[None, :], hidden)
        return logits[0], h_new

    return forward_seq, forward_step


# ----------------------------------------------------------------------------
# Parameters + references
# ----------------------------------------------------------------------------
def init_params(key, vocab_size, embedding_dim, hidden_size):
    ks = jax.random.split(key, 12)

    def u(k, shape, fan_in):
        bound = 1.0 / jnp.sqrt(fan_in)
        return jax.random.uniform(k, shape, jnp.float32, -bound, bound)

    return {
        "embeddings": jax.random.normal(ks[0], (vocab_size, embedding_dim), jnp.float32),
        "w_i2h": u(ks[1], (hidden_size, embedding_dim), embedding_dim),
        "w_i2z": u(ks[2], (hidden_size, embedding_dim), embedding_dim),
        "w_i2r": u(ks[3], (hidden_size, embedding_dim), embedding_dim),
        "w_h2h": u(ks[4], (hidden_size, hidden_size), hidden_size),
        "b_h2h": u(ks[5], (hidden_size,), hidden_size),
        "w_h2z": u(ks[6], (hidden_size, hidden_size), hidden_size),
        "b_h2z": u(ks[7], (hidden_size,), hidden_size),
        "w_h2r": u(ks[8], (hidden_size, hidden_size), hidden_size),
        "b_h2r": u(ks[9], (hidden_size,), hidden_size),
        "w_h2o": u(ks[10], (vocab_size, hidden_size), hidden_size),
        "b_h2o": u(ks[11], (vocab_size,), hidden_size),
    }


def reference_seq_mirror(tokens, hidden, packed):
    """Pure-JAX replica of the kernel's exact numeric recipe (bf16 MXU operands,
    f32 accumulation, f32 elementwise)."""
    d = packed["dims"]
    HP, H, V = d["HP"], d["H"], d["V"]
    q = lambda a: a.astype(jnp.bfloat16).astype(jnp.float32)
    emb = packed["emb"].astype(jnp.float32)
    wi = packed["w_i"].astype(jnp.float32)
    whrz = packed["w_h_rz"].astype(jnp.float32)
    whh = packed["w_h2h"].astype(jnp.float32)
    who = packed["w_h2o"].astype(jnp.float32)
    bhrz, bhh, bho = packed["b_h_rz"], packed["b_h2h"], packed["b_h2o"]

    T, B = tokens.shape
    h = jnp.zeros((B, HP), jnp.float32).at[:, :hidden.shape[1]].set(hidden.astype(jnp.float32))
    outs = []
    for t in range(T):
        x = emb[tokens[t]]
        xi = x @ wi
        hrz = q(h) @ whrz + bhrz
        gate = jax.nn.sigmoid(xi[:, :HP] + hrz[:, :HP])
        rate = jax.nn.sigmoid(xi[:, HP:2 * HP] + hrz[:, HP:2 * HP])
        h_hat = jnp.tanh(xi[:, 2 * HP:] + q(gate * h) @ whh + bhh)
        h = (1.0 - rate) * h + rate * h_hat
        outs.append(q(h) @ who + bho)
    logits = jnp.stack(outs)
    return logits[:, :, :V], h[:, :H]


def reference_seq_fp32(tokens, hidden, p):
    """Full-precision replica of the original PyTorch math (sanity check)."""
    T, _ = tokens.shape
    h = hidden.astype(jnp.float32)
    outs = []
    for t in range(T):
        x = p["embeddings"][tokens[t]]
        x_gate = x @ p["w_i2r"].T
        x_rate = x @ p["w_i2z"].T
        x_h = x @ p["w_i2h"].T
        gate = jax.nn.sigmoid(x_gate + h @ p["w_h2r"].T + p["b_h2r"])
        rate = jax.nn.sigmoid(x_rate + h @ p["w_h2z"].T + p["b_h2z"])
        h_hat = jnp.tanh(x_h + (gate * h) @ p["w_h2h"].T + p["b_h2h"])
        h = (1.0 - rate) * h + rate * h_hat
        outs.append(h @ p["w_h2o"].T + p["b_h2o"])
    return jnp.stack(outs), h


if __name__ == "__main__":
    vocab_size, embedding_dim, hidden_size = 256, 32, 32
    batch, seq_len = 8, 8

    key = jax.random.PRNGKey(0)
    pkey, tkey = jax.random.split(key)
    params = init_params(pkey, vocab_size, embedding_dim, hidden_size)
    packed = pack_params(params)                     # one-time fuse/transpose/pad/bf16

    forward_seq, forward_step = make_rnn_forward(packed)

    tokens = jax.random.randint(tkey, (seq_len, batch), 0, vocab_size, dtype=jnp.int32)
    hidden0 = jnp.zeros((batch, hidden_size), jnp.float32)

    logits_seq, h_final = forward_seq(tokens, hidden0)
    jax.block_until_ready((logits_seq, h_final))

    # exact-recipe check (same bf16 quantization points as the kernel)
    ref_logits, ref_h = reference_seq_mirror(tokens, hidden0, packed)
    assert jnp.allclose(logits_seq, ref_logits, atol=5e-3, rtol=5e-3)
    assert jnp.allclose(h_final, ref_h, atol=5e-3, rtol=5e-3)

    # loose check against the full-f32 original-module math
    fp_logits, fp_h = reference_seq_fp32(tokens, hidden0, params)
    assert jnp.allclose(logits_seq, fp_logits, atol=0.1, rtol=0.1)
    assert jnp.allclose(h_final, fp_h, atol=0.1, rtol=0.1)

    # single-step path (module forward / generate() usage, B=1)
    step_logits, step_h = forward_step(tokens[0, :1], hidden0[:1])
    jax.block_until_ready((step_logits, step_h))
    ref1_logits, ref1_h = reference_seq_mirror(tokens[:1, :1], hidden0[:1], packed)
    assert jnp.allclose(step_logits, ref1_logits[0], atol=5e-3, rtol=5e-3)
    assert jnp.allclose(step_h, ref1_h, atol=5e-3, rtol=5e-3)

    print("KERNEL_OK")
</pallas_src>

<mosaic_0001>
module attributes {stable_mosaic.version = 11 : i64} {
  func.func @gru_seq_kernel(%arg0: i32, %arg1: i32, %arg2: memref<1x8x128xbf16, #tpu.memory_space<vmem>>, %arg3: memref<8x128xf32, #tpu.memory_space<vmem>>, %arg4: memref<128x384xbf16, #tpu.memory_space<vmem>>, %arg5: memref<128x256xbf16, #tpu.memory_space<vmem>>, %arg6: memref<1x256xf32, #tpu.memory_space<vmem>>, %arg7: memref<128x128xbf16, #tpu.memory_space<vmem>>, %arg8: memref<1x128xf32, #tpu.memory_space<vmem>>, %arg9: memref<128x128xbf16, #tpu.memory_space<vmem>>, %arg10: memref<1x128xf32, #tpu.memory_space<vmem>>, %arg11: memref<1x8x128xf32, #tpu.memory_space<vmem>>, %arg12: memref<1x8x128xf32, #tpu.memory_space<vmem>>, %arg13: memref<8x128xf32, #tpu.memory_space<vmem>>) attributes {dimension_semantics = [#tpu.dimension_semantics<parallel>, #tpu.dimension_semantics<arbitrary>], iteration_bounds = array<i64: 2, 8>, scalar_prefetch = 0 : i64, scratch_operands = 1 : i64, tpu.core_type = #tpu.core_type<tc>, window_params = [{transform_indices = @transform_0, window_bounds = array<i64: 1, 8, 128>}, {pipeline_mode = #tpu.pipeline_mode<synchronous>, transform_indices = @transform_1, window_bounds = array<i64: 8, 128>}, {pipeline_mode = #tpu.pipeline_mode<synchronous>, transform_indices = @transform_2, window_bounds = array<i64: 128, 384>}, {pipeline_mode = #tpu.pipeline_mode<synchronous>, transform_indices = @transform_3, window_bounds = array<i64: 128, 256>}, {pipeline_mode = #tpu.pipeline_mode<synchronous>, transform_indices = @transform_4, window_bounds = array<i64: 1, 256>}, {pipeline_mode = #tpu.pipeline_mode<synchronous>, transform_indices = @transform_5, window_bounds = array<i64: 128, 128>}, {pipeline_mode = #tpu.pipeline_mode<synchronous>, transform_indices = @transform_6, window_bounds = array<i64: 1, 128>}, {transform_indices = @transform_7, window_bounds = array<i64: 128, 128>}, {transform_indices = @transform_8, window_bounds = array<i64: 1, 128>}, {transform_indices = @transform_9, window_bounds = array<i64: 1, 8, 128>}, {transform_indices = @transform_10, window_bounds = array<i64: 1, 8, 128>}]} {
    %c0_i32 = arith.constant 0 : i32
    %0 = arith.cmpi eq, %arg1, %c0_i32 : i32
    %1 = arith.extui %0 : i1 to i32
    %c0_i32_0 = arith.constant 0 : i32
    %2 = arith.cmpi ne, %1, %c0_i32_0 : i32
    scf.if %2 {
      %c0_31 = arith.constant 0 : index
      %c0_32 = arith.constant 0 : index
      %58 = vector.load %arg3[%c0_31, %c0_32] : memref<8x128xf32, #tpu.memory_space<vmem>>, vector<8x128xf32>
      %c0_33 = arith.constant 0 : index
      %c0_34 = arith.constant 0 : index
      %59 = vector.load %arg13[%c0_33, %c0_34] : memref<8x128xf32, #tpu.memory_space<vmem>>, vector<8x128xf32>
      tpu.vector_store %arg13[%c0_33, %c0_34], %58 {strides = array<i32>} : memref<8x128xf32, #tpu.memory_space<vmem>>, vector<8x128xf32>,
    } else {
    }
    %c0 = arith.constant 0 : index
    %c0_1 = arith.constant 0 : index
    %3 = vector.load %arg13[%c0, %c0_1] : memref<8x128xf32, #tpu.memory_space<vmem>>, vector<8x128xf32>
    %4 = arith.truncf %3 : vector<8x128xf32> to vector<8x128xbf16>
    %c0_2 = arith.constant 0 : index
    %c0_3 = arith.constant 0 : index
    %c0_4 = arith.constant 0 : index
    %5 = vector.load %arg2[%c0_2, %c0_3, %c0_4] : memref<1x8x128xbf16, #tpu.memory_space<vmem>>, vector<1x8x128xbf16>
    %6 = vector.shape_cast %5 : vector<1x8x128xbf16> to vector<8x128xbf16>
    %c0_5 = arith.constant 0 : index
    %c0_6 = arith.constant 0 : index
    %7 = vector.load %arg4[%c0_5, %c0_6] : memref<128x384xbf16, #tpu.memory_space<vmem>>, vector<128x384xbf16>
    %cst = arith.constant dense<0.000000e+00> : vector<8x384xf32>
    %8 = tpu.matmul %6, %7, %cst {dimension_numbers = #tpu.dot_dimension_numbers<[1], [0], [0], [1], [0, 0, 1, 1], [], []>} : vector<8x128xbf16>, vector<128x384xbf16>, vector<8x384xf32> -> vector<8x384xf32>
    %c0_7 = arith.constant 0 : index
    %c0_8 = arith.constant 0 : index
    %9 = vector.load %arg5[%c0_7, %c0_8] : memref<128x256xbf16, #tpu.memory_space<vmem>>, vector<128x256xbf16>
    %cst_9 = arith.constant dense<0.000000e+00> : vector<8x256xf32>
    %10 = tpu.matmul %4, %9, %cst_9 {dimension_numbers = #tpu.dot_dimension_numbers<[1], [0], [0], [1], [0, 0, 1, 1], [], []>} : vector<8x128xbf16>, vector<128x256xbf16>, vector<8x256xf32> -> vector<8x256xf32>
    %c0_10 = arith.constant 0 : index
    %c0_11 = arith.constant 0 : index
    %11 = vector.load %arg6[%c0_10, %c0_11] : memref<1x256xf32, #tpu.memory_space<vmem>>, vector<1x256xf32>
    %12 = vector.broadcast %11 : vector<1x256xf32> to vector<8x256xf32>
    %13 = arith.addf %10, %12 : vector<8x256xf32>
    %14 = vector.extract_strided_slice %8 {offsets = [0, 0], sizes = [8, 128], strides = [1, 1]} : vector<8x384xf32> to vector<8x128xf32>
    %15 = vector.extract_strided_slice %13 {offsets = [0, 0], sizes = [8, 128], strides = [1, 1]} : vector<8x256xf32> to vector<8x128xf32>
    %16 = arith.addf %14, %15 : vector<8x128xf32>
    %17 = arith.negf %16 : vector<8x128xf32>
    %18 = math.exp %17 : vector<8x128xf32>
    %cst_12 = arith.constant 1.000000e+00 : f32
    %19 = vector.broadcast %cst_12 : f32 to vector<8x128xf32>
    %20 = arith.addf %19, %18 : vector<8x128xf32>
    %21 = arith.divf %19, %20 : vector<8x128xf32>
    %22 = vector.extract_strided_slice %8 {offsets = [0, 128], sizes = [8, 128], strides = [1, 1]} : vector<8x384xf32> to vector<8x128xf32>
    %23 = vector.extract_strided_slice %13 {offsets = [0, 128], sizes = [8, 128], strides = [1, 1]} : vector<8x256xf32> to vector<8x128xf32>
    %24 = arith.addf %22, %23 : vector<8x128xf32>
    %25 = arith.negf %24 : vector<8x128xf32>
    %26 = math.exp %25 : vector<8x128xf32>
    %cst_13 = arith.constant 1.000000e+00 : f32
    %27 = vector.broadcast %cst_13 : f32 to vector<8x128xf32>
    %28 = arith.addf %27, %26 : vector<8x128xf32>
    %29 = arith.divf %27, %28 : vector<8x128xf32>
    %30 = arith.mulf %21, %3 : vector<8x128xf32>
    %31 = arith.truncf %30 : vector<8x128xf32> to vector<8x128xbf16>
    %32 = vector.extract_strided_slice %8 {offsets = [0, 256], sizes = [8, 128], strides = [1, 1]} : vector<8x384xf32> to vector<8x128xf32>
    %c0_14 = arith.constant 0 : index
    %c0_15 = arith.constant 0 : index
    %33 = vector.load %arg7[%c0_14, %c0_15] : memref<128x128xbf16, #tpu.memory_space<vmem>>, vector<128x128xbf16>
    %cst_16 = arith.constant dense<0.000000e+00> : vector<8x128xf32>
    %34 = tpu.matmul %31, %33, %cst_16 {dimension_numbers = #tpu.dot_dimension_numbers<[1], [0], [0], [1], [0, 0, 1, 1], [], []>} : vector<8x128xbf16>, vector<128x128xbf16>, vector<8x128xf32> -> vector<8x128xf32>
    %35 = arith.addf %32, %34 : vector<8x128xf32>
    %c0_17 = arith.constant 0 : index
    %c0_18 = arith.constant 0 : index
    %36 = vector.load %arg8[%c0_17, %c0_18] : memref<1x128xf32, #tpu.memory_space<vmem>>, vector<1x128xf32>
    %37 = vector.broadcast %36 : vector<1x128xf32> to vector<8x128xf32>
    %38 = arith.addf %35, %37 : vector<8x128xf32>
    %39 = math.tanh %38 : vector<8x128xf32>
    %cst_19 = arith.constant 1.000000e+00 : f32
    %40 = vector.broadcast %cst_19 : f32 to vector<8x128xf32>
    %41 = arith.subf %40, %29 : vector<8x128xf32>
    %42 = arith.mulf %41, %3 : vector<8x128xf32>
    %43 = arith.mulf %29, %39 : vector<8x128xf32>
    %44 = arith.addf %42, %43 : vector<8x128xf32>
    %c0_20 = arith.constant 0 : index
    %c0_21 = arith.constant 0 : index
    %45 = vector.load %arg13[%c0_20, %c0_21] : memref<8x128xf32, #tpu.memory_space<vmem>>, vector<8x128xf32>
    tpu.vector_store %arg13[%c0_20, %c0_21], %44 {strides = array<i32>} : memref<8x128xf32, #tpu.memory_space<vmem>>, vector<8x128xf32>,
    %46 = arith.truncf %44 : vector<8x128xf32> to vector<8x128xbf16>
    %c0_22 = arith.constant 0 : index
    %c0_23 = arith.constant 0 : index
    %47 = vector.load %arg9[%c0_22, %c0_23] : memref<128x128xbf16, #tpu.memory_space<vmem>>, vector<128x128xbf16>
    %cst_24 = arith.constant dense<0.000000e+00> : vector<8x128xf32>
    %48 = tpu.matmul %46, %47, %cst_24 {dimension_numbers = #tpu.dot_dimension_numbers<[1], [0], [0], [1], [0, 0, 1, 1], [], []>} : vector<8x128xbf16>, vector<128x128xbf16>, vector<8x128xf32> -> vector<8x128xf32>
    %c0_25 = arith.constant 0 : index
    %c0_26 = arith.constant 0 : index
    %49 = vector.load %arg10[%c0_25, %c0_26] : memref<1x128xf32, #tpu.memory_space<vmem>>, vector<1x128xf32>
    %50 = vector.broadcast %49 : vector<1x128xf32> to vector<8x128xf32>
    %51 = arith.addf %48, %50 : vector<8x128xf32>
    %c0_27 = arith.constant 0 : index
    %c0_28 = arith.constant 0 : index
    %c0_29 = arith.constant 0 : index
    %52 = vector.load %arg11[%c0_27, %c0_28, %c0_29] : memref<1x8x128xf32, #tpu.memory_space<vmem>>, vector<1x8x128xf32>
    %53 = vector.shape_cast %52 : vector<1x8x128xf32> to vector<8x128xf32>
    %54 = vector.shape_cast %51 : vector<8x128xf32> to vector<1x8x128xf32>
    tpu.vector_store %arg11[%c0_27, %c0_28, %c0_29], %54 {strides = array<i32>} : memref<1x8x128xf32, #tpu.memory_space<vmem>>, vector<1x8x128xf32>,
    %c7_i32 = arith.constant 7 : i32
    %55 = arith.cmpi eq, %arg1, %c7_i32 : i32
    %56 = arith.extui %55 : i1 to i32
    %c0_i32_30 = arith.constant 0 : i32
    %57 = arith.cmpi ne, %56, %c0_i32_30 : i32
    scf.if %57 {
      %c0_31 = arith.constant 0 : index
      %c0_32 = arith.constant 0 : index
      %c0_33 = arith.constant 0 : index
      %58 = vector.load %arg12[%c0_31, %c0_32, %c0_33] : memref<1x8x128xf32, #tpu.memory_space<vmem>>, vector<1x8x128xf32>
      %59 = vector.shape_cast %58 : vector<1x8x128xf32> to vector<8x128xf32>
      %60 = vector.shape_cast %44 : vector<8x128xf32> to vector<1x8x128xf32>
      tpu.vector_store %arg12[%c0_31, %c0_32, %c0_33], %60 {strides = array<i32>} : memref<1x8x128xf32, #tpu.memory_space<vmem>>, vector<1x8x128xf32>,
    } else {
    }
    return
  }
  func.func @transform_0(%arg0: i32, %arg1: i32) -> (i32, i32, i32) {
    %c0_i32 = arith.constant 0 : i32
    %c0_i32_0 = arith.constant 0 : i32
    %c0_i32_1 = arith.constant 0 : i32
    return %arg1, %c0_i32, %c0_i32_0 : i32, i32, i32
  }
  func.func @transform_1(%arg0: i32, %arg1: i32) -> (i32, i32) {
    %c0_i32 = arith.constant 0 : i32
    %c0_i32_0 = arith.constant 0 : i32
    %c0_i32_1 = arith.constant 0 : i32
    return %c0_i32, %c0_i32_0 : i32, i32
  }
  func.func @transform_2(%arg0: i32, %arg1: i32) -> (i32, i32) {
    %c0_i32 = arith.constant 0 : i32
    %c0_i32_0 = arith.constant 0 : i32
    %c0_i32_1 = arith.constant 0 : i32
    return %c0_i32, %c0_i32_0 : i32, i32
  }
  func.func @transform_3(%arg0: i32, %arg1: i32) -> (i32, i32) {
    %c0_i32 = arith.constant 0 : i32
    %c0_i32_0 = arith.constant 0 : i32
    %c0_i32_1 = arith.constant 0 : i32
    return %c0_i32, %c0_i32_0 : i32, i32
  }
  func.func @transform_4(%arg0: i32, %arg1: i32) -> (i32, i32) {
    %c0_i32 = arith.constant 0 : i32
    %c0_i32_0 = arith.constant 0 : i32
    %c0_i32_1 = arith.constant 0 : i32
    return %c0_i32, %c0_i32_0 : i32, i32
  }
  func.func @transform_5(%arg0: i32, %arg1: i32) -> (i32, i32) {
    %c0_i32 = arith.constant 0 : i32
    %c0_i32_0 = arith.constant 0 : i32
    %c0_i32_1 = arith.constant 0 : i32
    return %c0_i32, %c0_i32_0 : i32, i32
  }
  func.func @transform_6(%arg0: i32, %arg1: i32) -> (i32, i32) {
    %c0_i32 = arith.constant 0 : i32
    %c0_i32_0 = arith.constant 0 : i32
    %c0_i32_1 = arith.constant 0 : i32
    return %c0_i32, %c0_i32_0 : i32, i32
  }
  func.func @transform_7(%arg0: i32, %arg1: i32) -> (i32, i32) {
    %c0_i32 = arith.constant 0 : i32
    %c0_i32_0 = arith.constant 0 : i32
    return %c0_i32, %arg0 : i32, i32
  }
  func.func @transform_8(%arg0: i32, %arg1: i32) -> (i32, i32) {
    %c0_i32 = arith.constant 0 : i32
    %c0_i32_0 = arith.constant 0 : i32
    return %c0_i32, %arg0 : i32, i32
  }
  func.func @transform_9(%arg0: i32, %arg1: i32) -> (i32, i32, i32) {
    %c0_i32 = arith.constant 0 : i32
    %c0_i32_0 = arith.constant 0 : i32
    return %arg1, %c0_i32, %arg0 : i32, i32, i32
  }
  func.func @transform_10(%arg0: i32, %arg1: i32) -> (i32, i32, i32) {
    %c0_i32 = arith.constant 0 : i32
    %c0_i32_0 = arith.constant 0 : i32
    %c0_i32_1 = arith.constant 0 : i32
    return %arg0, %c0_i32, %c0_i32_0 : i32, i32, i32
  }
}

</mosaic_0001>

<bundles_post_ra>
// kernel: forward_seq.1
= control target key start
LH: loop header
LB: loop body
LE: loop exit
PB: predicated region body
PF: predicated region fallthrough
CT: control target
= control target key end

     0   :  { %s2245_s0 = inlined_call_operand.vmem [shape: bf16[8,8,128], index: 0, kind: input, shape index: {}]   ;;  %s2246_s1 = inlined_call_operand.vmem [shape: f32[8,128], index: 1, kind: input, shape index: {}]   ;;  %s2247_s2 = inlined_call_operand.vmem [shape: bf16[128,384], index: 2, kind: input, shape index: {}]   ;;  %s2248_s3 = inlined_call_operand.vmem [shape: bf16[128,256], index: 3, kind: input, shape index: {}]   ;;  %s2249_s4 = inlined_call_operand.vmem [shape: f32[1,256], index: 4, kind: input, shape index: {}]   ;;  %s2250_s5 = inlined_call_operand.vmem [shape: bf16[128,128], index: 5, kind: input, shape index: {}]   ;;  %s2251_s6 = inlined_call_operand.vmem [shape: f32[1,128], index: 6, kind: input, shape index: {}]   ;;  %s2252_s7 = inlined_call_operand.vmem [shape: bf16[128,256], index: 7, kind: input, shape index: {}]   ;;  %s2253_s8 = inlined_call_operand.vmem [shape: f32[1,256], index: 8, kind: input, shape index: {}]   ;;  %s2254_s9 = inlined_call_operand.hbm [shape: f32[8,8,256], index: 9, kind: output, shape index: {0}]   ;;  %s2255_s10 = inlined_call_operand.vmem [shape: f32[2,8,128], index: 10, kind: output, shape index: {1}]  }
   0x1   :  { %2265 = sst [smem:[#allocation16_spill]] %s2251_s6 }
   0x2   :  { %2266 = sst [smem:[#allocation17_spill]] %s2252_s7 }
   0x3   :  { %2267 = sst [smem:[#allocation18_spill]] %s2254_s9 }
   0x4   :  { %16 = vsyncpa [#allocation5], 0 }
   0x5   :  { %18 = vsyncpa [#allocation5 + $0x1], 0  ;;  %s1828_s13 = smov 0   ;;  %s1830_s14 = smov 0  }
   0x6   :  { %s1832_s15 = smov 0   ;;  %s1834_s16 = smov 0  }
   0x7   :  { %s1836_s17 = smov 0   ;;  %s1838_s18 = smov 0  }
   0x8   :  { %s1840_s19 = smov 0   ;;  %s1842_s20 = smov 0  }
   0x9   :  { %s1844_s21 = smov 0   ;;  %s1846_s22 = smov 0  }
   0xa LB: > { %2268 = sst [smem:[#allocation7_spill]] %s1739_s15  ;;  %s1314_s23 = sadd.s32 4294967295, %s1767_s22   ;;  %s1767_s22 = sphi %s1846_s22, %s24_s22   ;;  %s1763_s21 = sphi %s1844_s21, %s2296_s21   ;;  %s1759_s20 = sphi %s1842_s20, %s2292_s20   ;;  %s1755_s19 = sphi %s1840_s19, %s2291_s19   ;;  %s1751_s18 = sphi %s1838_s18, %s2290_s18   ;;  %s1747_s17 = sphi %s1836_s17, %s2289_s17   ;;  %s1743_s16 = sphi %s1834_s16, %s2288_s16   ;;  %s1739_s15 = sphi %s1832_s15, %s2287_s15   ;;  %s1735_s14 = sphi %s1830_s14, %s2295_s14   ;;  %s1731_s13 = sphi %s1828_s13, %s2294_s13  }
   0xb   : > { %2269 = sst [smem:[#allocation8_spill]] %s1747_s17  ;;  %s1315_s24 = sadd.s32 4294967294, %s1767_s22  }
   0xc   : > { %2270 = sst [smem:[#allocation9_spill]] %s1759_s20  ;;  %s33_s25 = sadd.s32 1, %s1759_s20 }
   0xd   : > { %2271 = sst [smem:[#allocation10_spill]] %s1763_s21  ;;  %s36_s26 = sadd.s32 1, %s1763_s21 }
   0xe   : > { %p34_p0 = scmp.ge.s32.totalorder %s33_s25, 8  ;;  %s195_s27 = sadd.s32 1, %s1747_s17 }
   0xf   : > { %p202_p1 = scmp.ne.s32.totalorder %s1747_s17, %s1743_s16  ;;  %p203_p2 = scmp.eq.s32.totalorder %s1767_s22, 0 }
  0x10   : > { %s2298_s25 = smov (%p34_p0, %s33_s25), 0  ;;  %s2300_s26 = smov (!%p34_p0, %s36_s26), %s1763_s21 }
  0x11   : > { %2272 = sst [smem:[#allocation11_spill]] %s2298_s25  ;;  %p1889_p3 = por %p203_p2, %p202_p1 }
  0x12   : > { %s244_s29 = ssub.s32 %s1759_s20, %s2298_s25  ;;  %p38_p4 = scmp.ge.s32.totalorder %s2300_s26, 2 }
  0x13   : > { %s249_s30 = sadd.s32 1, %s1739_s15  ;;  %p259_p5 = scmp.ne.s32.totalorder %s1739_s15, %s1735_s14 }
  0x14   : > { %p260_p6 = scmp.eq.s32.totalorder %s1314_s23, 15  ;;  %s2302_s26 = smov (%p38_p4, %s2300_s26), 0 }
  0x15   : > { %2274 = sst [smem:[#allocation12_spill]] %s2302_s26  ;;  %p265_p8 = scmp.ne.s32.totalorder %s1735_s14, %s1731_s13 }
  0x16   : > { %p1900_p7 = por %p260_p6, %p259_p5  ;;  %s192_s12 = ssub.s32 %s1763_s21, %s2302_s26 }
  0x17   : > { %p266_p9 = scmp.eq.s32.totalorder %s1315_s24, 15  ;;  %p193_p10 = scmp.eq.s32.totalorder %s192_s12, 0 }
  0x18   : > { %s246_s9 = sor.u32 %s244_s29, %s192_s12  ;;  %p1317_p13 = scmp.ge.s32.totalorder %s1767_s22, 16 }
  0x19   : > { %p247_p11 = scmp.eq.s32.totalorder %s246_s9, 0  ;;  %p1908_p12 = por %p266_p9, %p265_p8 }
  0x1a   : > { %s1913_s25 = scalar_select %p193_p10, %s1747_s17, %s195_s27  }
  0x1b   : > { %s2276_s6 = scalar_select %p1908_p12, 1, 0 }
  0x1c   : > { %2278 = sst [smem:[#allocation14_spill]] %s1913_s25  ;;  %326 = sbr.rel (%p1317_p13) target bundleno = 55 (0x37), region = 40 }
  0x1d   : > { %2277 = sst [smem:[#allocation13_spill]] %s2276_s6 }
  0x1e   : > { %s1916_s23 = scalar_select %p247_p11, %s1739_s15, %s249_s30  }
  0x20   : > { %2279 = sst [smem:[#allocation15_spill]] %s1916_s23 }
  0x23   : > { %336 = sbr.rel (!%p1889_p3) target bundleno = 55 (0x37), region = 48  ;;  %s338_s24 = sand.u32 (%p1889_p3), 1, %s1747_s17  }
  0x24   : > { %s1319_s26 = sshll.u32 (%p1889_p3), %s1763_s21, 2  ;;  %s1318_s29 = sshll.u32 (%p1889_p3), %s338_s24, 6 }
  0x25   : > { %s2280_s7 = sld [smem:[#allocation17_spill]] (%p1889_p3)  ;;  %s340_s27 = scalar_lea.vmem (%p1889_p3), [#allocation3], %s1318_s29 }
  0x2b   : > { %s1926_s20 = scalar_lea.vmem %s2280_s7, %s1319_s26 }
  0x2c   : > { %v358_v0 = vld [vmem:[%s1926_s20] sm:$0xf]  ;;  %v360_v1 = vld [vmem:[%s1926_s20 + $0x8] sm:$0xf]  ;;  %v362_v2 = vld [vmem:[%s1926_s20 + $0x10] sm:$0xf] }
  0x2d   : > { %359 = vst [vmem:[%s340_s27] sm:$0xf] %v358_v0  ;;  %361 = vst [vmem:[%s340_s27 + $0x4] sm:$0xf] %v360_v1  ;;  %v364_v3 = vld [vmem:[%s1926_s20 + $0x18] sm:$0xf] }
  0x2e   : > { %v366_v4 = vld [vmem:[%s1926_s20 + $0x20] sm:$0xf]  ;;  %363 = vst [vmem:[%s340_s27 + $0x8] sm:$0xf] %v362_v2  ;;  %365 = vst [vmem:[%s340_s27 + $0xc] sm:$0xf] %v364_v3 }
  0x2f   : > { %367 = vst [vmem:[%s340_s27 + $0x10] sm:$0xf] %v366_v4  ;;  %v368_v5 = vld [vmem:[%s1926_s20 + $0x28] sm:$0xf]  ;;  %v370_v6 = vld [vmem:[%s1926_s20 + $0x30] sm:$0xf] }
  0x30   : > { %v372_v7 = vld [vmem:[%s1926_s20 + $0x38] sm:$0xf]  ;;  %369 = vst [vmem:[%s340_s27 + $0x14] sm:$0xf] %v368_v5  ;;  %371 = vst [vmem:[%s340_s27 + $0x18] sm:$0xf] %v370_v6 }
  0x31   : > { %373 = vst [vmem:[%s340_s27 + $0x1c] sm:$0xf] %v372_v7  ;;  %v374_v8 = vld [vmem:[%s1926_s20 + $0x40] sm:$0xf]  ;;  %v376_v9 = vld [vmem:[%s1926_s20 + $0x48] sm:$0xf] }
  0x32   : > { %v378_v10 = vld [vmem:[%s1926_s20 + $0x50] sm:$0xf]  ;;  %375 = vst [vmem:[%s340_s27 + $0x20] sm:$0xf] %v374_v8  ;;  %377 = vst [vmem:[%s340_s27 + $0x24] sm:$0xf] %v376_v9 }
  0x33   : > { %379 = vst [vmem:[%s340_s27 + $0x28] sm:$0xf] %v378_v10  ;;  %v380_v11 = vld [vmem:[%s1926_s20 + $0x58] sm:$0xf]  ;;  %v382_v12 = vld [vmem:[%s1926_s20 + $0x60] sm:$0xf] }
  0x34   : > { %v384_v13 = vld [vmem:[%s1926_s20 + $0x68] sm:$0xf]  ;;  %381 = vst [vmem:[%s340_s27 + $0x2c] sm:$0xf] %v380_v11  ;;  %383 = vst [vmem:[%s340_s27 + $0x30] sm:$0xf] %v382_v12 }
  0x35   : > { %385 = vst [vmem:[%s340_s27 + $0x34] sm:$0xf] %v384_v13  ;;  %v386_v14 = vld [vmem:[%s1926_s20 + $0x70] sm:$0xf]  ;;  %v388_v15 = vld [vmem:[%s1926_s20 + $0x78] sm:$0xf] }
  0x36   : > { %387 = vst [vmem:[%s340_s27 + $0x38] sm:$0xf] %v386_v14  ;;  %389 = vst [vmem:[%s340_s27 + $0x3c] sm:$0xf] %v388_v15 }
  0x37 PF: > { %p1320_p0 = scmp.ge.s32.totalorder %s1767_s22, 1  ;;  %p449_p1 = scmp.lt.s32.totalorder %s1767_s22, 17 }
  0x39   : > { %p450_p2 = pnand %p1320_p0, %p449_p1 }
  0x3a   : > { %s456_s26 = sand.u32 (!%p450_p2), 1, %s1743_s16   ;;  %s2261_s28 = sand.u32 (!%p450_p2), 1, %s1735_s14  }
  0x3b   : > { %453 = sbr.rel (%p450_p2) target bundleno = 861 (0x35d), region = 93  ;;  %s1321_s20 = sshll.u32 (!%p450_p2), %s456_s26, 6 }
  0x3c   : > { %s1950_s30 = sshll.u32 (!%p450_p2), %s2261_s28, 3  ;;  %p504_p3 = scmp.lt.s32.totalorder (!%p450_p2), %s1751_s18, 7 }
  0x3d   : > { %p508_p4 = scmp.lt.s32.totalorder (!%p450_p2), %s1755_s19, 1  ;;  %s1973_s15 = scalar_lea.vmem (!%p450_p2), [#allocation3], %s1321_s20 }
  0x3e   : > { %s497_s6 = scalar_lea.vmem (!%p450_p2), [#allocation4], %s1950_s30  ;;  %p1325_p5 = scmp.ne.s32.totalorder (!%p450_p2), %s1751_s18, 0 }
  0x42   : > { %s505_s24 = scalar_select %p504_p3, %s1751_s18, 7 }
  0x43   : > { %s1956_s29 = scalar_select %p508_p4, %s1755_s19, 1 }
  0x44   : > { %s1323_s9 = sshll.u32 %s505_s24, 2  ;;  %519 = sbr.rel (%p1325_p5) target bundleno = 75 (0x4b), region = 101  ;;  %v520_v16 = vld [vmem:[%s2246_s1] sm:$0xff] (!%p1325_p5) }
  0x45   : > { %s1961_s7 = scalar_lea.vmem %s2245_s0, %s1323_s9  ;;  %s510_s26 = scalar_lea.vmem %s2253_s8, %s1956_s29  ;;  %521 = vst [vmem:[#allocation2] sm:$0xff] (!%p1325_p5), %v520_v16 }
  0x46   : > { %s1324_s28 = sshll.u32 %s1956_s29, 3 }
  0x47   : > { %s1971_s23 = scalar_lea.vmem %s2255_s10, %s1324_s28 }
  0x4b PF: > { %v1575_v17 = vld [vmem:[%s2247_s2 + $0x4] ss:$12 sps:$4 sm:$0xff]   ;;  %v1577_v18 = vld [vmem:[%s2247_s2] ss:$12 sps:$4 sm:$0xff]   ;;  %v1769_v19 = vmov 0   ;;  %v1770_v20 = vmov 0.0   ;;  %v784_v9 = vlaneseq }
  0x4c   : > { %717 = vmatprep.mubr.bf16.mxu0 %v1769_v19  ;;  %1419 = vmatprep.subr.bf16.mxu1 %v1770_v20  ;;  %v1578_v21 = vld [vmem:[%s2247_s2 + $0x1c] ss:$12 sps:$4 sm:$0xff]   ;;  %vm1771_vm0 = vmmov 0   ;;  %v1580_v22 = vld [vmem:[%s2247_s2 + $0x18] ss:$12 sps:$4 sm:$0xff]   ;;  %v1633_v0 = vld [vmem:[%s2250_s5 + $0x10] sm:$0xff]  }
  0x4d   : > { %685 = vmatprep.subr.bf16.mxu0 %v1575_v17  ;;  %1435 = vmatprep.mubr.msk.bf16.mxu1 %vm1771_vm0, %v1770_v20  ;;  %v1581_v23 = vld [vmem:[%s2247_s2 + $0x34] ss:$12 sps:$4 sm:$0xff]   ;;  %v1583_v24 = vld [vmem:[%s2247_s2 + $0x30] ss:$12 sps:$4 sm:$0xff]   ;;  %v1584_v25 = vld [vmem:[%s2247_s2 + $0x4c] ss:$12 sps:$4 sm:$0xff]  }
  0x4e   : > { %686 = vmatpush1.bf16.msra.mxu0 %v1577_v18  ;;  %v1586_v26 = vld [vmem:[%s2247_s2 + $0x48] ss:$12 sps:$4 sm:$0xff]   ;;  %v1587_v27 = vld [vmem:[%s2247_s2 + $0x64] ss:$12 sps:$4 sm:$0xff]   ;;  %v1589_v28 = vld [vmem:[%s2247_s2 + $0x60] ss:$12 sps:$4 sm:$0xff]  }
  0x4f   : > { %687 = vmatprep.subr.bf16.mxu0 %v1578_v21  ;;  %v1590_v29 = vld [vmem:[%s2247_s2 + $0x7c] ss:$12 sps:$4 sm:$0xff]   ;;  %v1592_v30 = vld [vmem:[%s2247_s2 + $0x78] ss:$12 sps:$4 sm:$0xff]   ;;  %v1593_v31 = vld [vmem:[%s2247_s2 + $0x94] ss:$12 sps:$4 sm:$0xff]  }
  0x50   : > { %v1595_v32 = vld [vmem:[%s2247_s2 + $0x90] ss:$12 sps:$4 sm:$0xff]   ;;  %v1623_v33 = vld [vmem:[%s2247_s2 + $0x8] ss:$12 sps:$4 sm:$0xff]   ;;  %v1596_v34 = vld [vmem:[%s2247_s2 + $0xac] ss:$12 sps:$4 sm:$0xff]  }
  0x51   : > { %1420 = vmatpush3.bf16.msra.mxu1 %v1623_v33  ;;  %v1624_v35 = vld [vmem:[%s2247_s2 + $0x20] ss:$12 sps:$4 sm:$0xff]   ;;  %v1598_v36 = vld [vmem:[%s2247_s2 + $0xa8] ss:$12 sps:$4 sm:$0xff]   ;;  %v1625_v38 = vld [vmem:[%s2247_s2 + $0x38] ss:$12 sps:$4 sm:$0xff]  }
  0x52   : > { %688 = vmatpush1.bf16.msra.mxu0 %v1580_v22  ;;  %1421 = vmatprep.subr.bf16.mxu1 %v1770_v20  ;;  %v1601_v37 = vld [vmem:[%s2248_s3 + $0x4] ss:$8 sps:$4 sm:$0xff]   ;;  %v1599_v39 = vld [vmem:[%s2248_s3] ss:$8 sps:$4 sm:$0xff]   ;;  %v1604_v41 = vld [vmem:[%s2248_s3 + $0x14] ss:$8 sps:$4 sm:$0xff]  }
  0x53   : > { %689 = vmatprep.subr.bf16.mxu0 %v1581_v23  ;;  %v524_v40 = vld [vmem:[%s1961_s7] sm:$0xf]  ;;  %v1626_v42 = vld [vmem:[%s2247_s2 + $0x50] ss:$12 sps:$4 sm:$0xff]   ;;  %v1607_v44 = vld [vmem:[%s2248_s3 + $0x24] ss:$8 sps:$4 sm:$0xff]  }
  0x54   : > { %v1602_v43 = vld [vmem:[%s2248_s3 + $0x10] ss:$8 sps:$4 sm:$0xff]   ;;  %v1627_v45 = vld [vmem:[%s2247_s2 + $0x68] ss:$12 sps:$4 sm:$0xff]   ;;  %v1628_v48 = vld [vmem:[%s2247_s2 + $0x80] ss:$12 sps:$4 sm:$0xff]  }
  0x55   : > { %1422 = vmatpush3.bf16.msra.mxu1 %v1624_v35  ;;  %v1605_v46 = vld [vmem:[%s2248_s3 + $0x20] ss:$8 sps:$4 sm:$0xff]   ;;  %v1610_v47 = vld [vmem:[%s2248_s3 + $0x34] ss:$8 sps:$4 sm:$0xff]   ;;  %v1608_v49 = vld [vmem:[%s2248_s3 + $0x30] ss:$8 sps:$4 sm:$0xff]  }
  0x56   : > { %690 = vmatpush1.bf16.msra.mxu0 %v1583_v24  ;;  %1423 = vmatprep.subr.bf16.mxu1 %v1770_v20  ;;  %v1613_v50 = vld [vmem:[%s2248_s3 + $0x44] ss:$8 sps:$4 sm:$0xff]   ;;  %v1611_v52 = vld [vmem:[%s2248_s3 + $0x40] ss:$8 sps:$4 sm:$0xff]   ;;  %v1616_v53 = vld [vmem:[%s2248_s3 + $0x54] ss:$8 sps:$4 sm:$0xff]  }
  0x57   : > { %691 = vmatprep.subr.bf16.mxu0 %v1584_v25  ;;  %v1629_v51 = vld [vmem:[%s2247_s2 + $0x98] ss:$12 sps:$4 sm:$0xff]   ;;  %v1630_v54 = vld [vmem:[%s2247_s2 + $0xb0] ss:$12 sps:$4 sm:$0xff]   ;;  %v1617_v57 = vld [vmem:[%s2248_s3 + $0x60] ss:$8 sps:$4 sm:$0xff]  }
  0x58   : > { %v1614_v55 = vld [vmem:[%s2248_s3 + $0x50] ss:$8 sps:$4 sm:$0xff]   ;;  %v1619_v56 = vld [vmem:[%s2248_s3 + $0x64] ss:$8 sps:$4 sm:$0xff]   ;;  %v1622_v58 = vld [vmem:[%s2248_s3 + $0x74] ss:$8 sps:$4 sm:$0xff]  }
  0x59   : > { %1424 = vmatpush3.bf16.msra.mxu1 %v1625_v38  ;;  %v1620_v59 = vld [vmem:[%s2248_s3 + $0x70] ss:$8 sps:$4 sm:$0xff]   ;;  %v2114_v60 = vld [vmem:[#allocation2] sm:$0xff]  ;;  %v1632_v63 = vld [vmem:[%s2250_s5 + $0x8] sm:$0xff]   ;;  %v785_v10 = vshrl.u32 %v784_v9, 7  ;;  %s2281_s28 = sld [smem:[#allocation16_spill]] }
  0x5a   : > { %692 = vmatpush1.bf16.msra.mxu0 %v1586_v26  ;;  %1425 = vmatprep.subr.bf16.mxu1 %v1770_v20  ;;  %v523_v61 = vpack.c.bf16 %v2114_v60, %v2114_v60  ;;  %v1631_v62 = vld [vmem:[%s2250_s5] sm:$0xff]   ;;  %v1634_v1 = vld [vmem:[%s2250_s5 + $0x18] sm:$0xff]   ;;  %v1636_v3 = vld [vmem:[%s2250_s5 + $0x28] sm:$0xff]   ;;  %p1386_p6 = scmp.ne.s32.totalorder %s1751_s18, 7 }
  0x5b   : > { %693 = vmatprep.subr.bf16.mxu0 %v1587_v27  ;;  %v1635_v2 = vld [vmem:[%s2250_s5 + $0x20] sm:$0xff]   ;;  %v1637_v4 = vld [vmem:[%s2250_s5 + $0x30] sm:$0xff]   ;;  %v1638_v5 = vld [vmem:[%s2250_s5 + $0x38] sm:$0xff]   ;;  %v786_v15 = vsub.s32 0, %v785_v10  ;;  %v790_v35 = vsub.s32 1, %v785_v10 }
  0x5c   : > { %v1639_v6 = vld [vmem:[%s1973_s15] sm:$0xff]   ;;  %v1640_v7 = vld [vmem:[%s1973_s15 + $0x8] sm:$0xff]   ;;  %v1641_v8 = vld [vmem:[%s1973_s15 + $0x10] sm:$0xff]  }
  0x5d   : > { %1426 = vmatpush3.bf16.msra.mxu1 %v1626_v42  ;;  %v782_v16 = vld [vmem:[%s2249_s4] sm:$0x3]  ;;  %v1645_v33 = vld [vmem:[%s1973_s15 + $0x30] sm:$0xff]  }
  0x5e   : > { %694 = vmatpush1.bf16.msra.mxu0 %v1589_v28  ;;  %1427 = vmatprep.subr.bf16.mxu1 %v1770_v20  ;;  %v787_v17 = vrot.slane %v782_v16, %v786_v15 }
  0x5f   : > { %695 = vmatprep.subr.bf16.mxu0 %v1590_v29  ;;  %v1376_v42 = vld [vmem:[%s2281_s28] ss:$0 sm:$0xff] }
  0x61   : > { %1428 = vmatpush3.bf16.msra.mxu1 %v1627_v45 }
  0x62   : > { %696 = vmatpush1.bf16.msra.mxu0 %v1592_v30  ;;  %1429 = vmatprep.subr.bf16.mxu1 %v1770_v20  ;;  %v1642_v30 = vld [vmem:[%s1973_s15 + $0x18] sm:$0xff]  }
  0x63   : > { %697 = vmatprep.subr.bf16.mxu0 %v1593_v31  ;;  %v1643_v31 = vld [vmem:[%s1973_s15 + $0x20] sm:$0xff]  }
  0x65   : > { %1430 = vmatpush3.bf16.msra.mxu1 %v1628_v48 }
  0x66   : > { %698 = vmatpush1.bf16.msra.mxu0 %v1595_v32  ;;  %1431 = vmatprep.subr.bf16.mxu1 %v1770_v20  ;;  %v1644_v32 = vld [vmem:[%s1973_s15 + $0x28] sm:$0xff]  }
  0x67   : > { %699 = vmatprep.subr.bf16.mxu0 %v1596_v34  ;;  %v1646_v34 = vld [vmem:[%s1973_s15 + $0x38] sm:$0xff]  }
  0x69   : > { %1432 = vmatpush3.bf16.msra.mxu1 %v1629_v51 }
  0x6a   : > { %700 = vmatpush1.bf16.msra.mxu0 %v1598_v36  ;;  %1433 = vmatprep.subr.bf16.mxu1 %v1770_v20  ;;  %v791_v36 = vrot.slane %v782_v16, %v790_v35 }
  0x6b   : > { %874 = vmatprep.subr.bf16.mxu0 %v1601_v37 }
  0x6d   : > { %718 = vmatmul.mubr.bf16.vlgmr.msra.gmra.mrb[0].mxu0 %v524_v40  ;;  %1434 = vmatpush3.bf16.msra.mxu1 %v1630_v54  ;;  %v1377_v54 = vld [vmem:[%s510_s26] ss:$0 sm:$0xff] }
  0x6e   : > { %875 = vmatpush1.bf16.msra.mxu0 %v1599_v39  ;;  %906 = vmatprep.mubr.bf16.mxu0 %v1769_v19 }
  0x6f   : > { %876 = vmatprep.subr.bf16.mxu0 %v1604_v41  ;;  %1439 = vmatprep.subr.bf16.mxu1 %v1770_v20 }
  0x70   : > { %1436 = vmatmul.mubr.bf16.vlgmr.msra.gmra.mrb[0].mxu1 %v524_v40 }
  0x71   : > { %1455 = vmatprep.mubr.msk.bf16.mxu1 %vm1771_vm0, %v1770_v20  ;;  %1440 = vmatpush3.bf16.msra.mxu1 %v1631_v62 }
  0x72   : > { %877 = vmatpush1.bf16.msra.mxu0 %v1602_v43  ;;  %1441 = vmatprep.subr.bf16.mxu1 %v1770_v20 }
  0x73   : > { %878 = vmatprep.subr.bf16.mxu0 %v1607_v44 }
  0x75   : > { %1442 = vmatpush3.bf16.msra.mxu1 %v1632_v63 }
  0x76   : > { %879 = vmatpush1.bf16.msra.mxu0 %v1605_v46  ;;  %1443 = vmatprep.subr.bf16.mxu1 %v1770_v20 }
  0x77   : > { %880 = vmatprep.subr.bf16.mxu0 %v1610_v47 }
  0x79   : > { %1444 = vmatpush3.bf16.msra.mxu1 %v1633_v0 }
  0x7a   : > { %881 = vmatpush1.bf16.msra.mxu0 %v1608_v49  ;;  %1445 = vmatprep.subr.bf16.mxu1 %v1770_v20 }
  0x7b   : > { %882 = vmatprep.subr.bf16.mxu0 %v1613_v50 }
  0x7d   : > { %1446 = vmatpush3.bf16.msra.mxu1 %v1634_v1 }
  0x7e   : > { %883 = vmatpush1.bf16.msra.mxu0 %v1611_v52  ;;  %1447 = vmatprep.subr.bf16.mxu1 %v1770_v20 }
  0x7f   : > { %884 = vmatprep.subr.bf16.mxu0 %v1616_v53 }
  0x81   : > { %1448 = vmatpush3.bf16.msra.mxu1 %v1635_v2 }
  0x82   : > { %885 = vmatpush1.bf16.msra.mxu0 %v1614_v55  ;;  %1449 = vmatprep.subr.bf16.mxu1 %v1770_v20 }
  0x83   : > { %886 = vmatprep.subr.bf16.mxu0 %v1619_v56 }
  0x85   : > { %1450 = vmatpush3.bf16.msra.mxu1 %v1636_v3 }
  0x86   : > { %887 = vmatpush1.bf16.msra.mxu0 %v1617_v57  ;;  %1451 = vmatprep.subr.bf16.mxu1 %v1770_v20 }
  0x87   : > { %888 = vmatprep.subr.bf16.mxu0 %v1622_v58 }
  0x89   : > { %1452 = vmatpush3.bf16.msra.mxu1 %v1637_v4 }
  0x8a   : > { %889 = vmatpush1.bf16.msra.mxu0 %v1620_v59  ;;  %1453 = vmatprep.subr.bf16.mxu1 %v1770_v20 }
  0x8b   : > { %1459 = vmatprep.subr.bf16.mxu0 %v1770_v20 }
  0x8d   : > { %907 = vmatmul.mubr.bf16.vlgmr.msra.gmra.mrb[0].mxu0 %v523_v61  ;;  %1454 = vmatpush3.bf16.msra.mxu1 %v1638_v5 }
  0x8e   : > { %1475 = vmatprep.mubr.msk.bf16.mxu0 %vm1771_vm0, %v1770_v20  ;;  %1460 = vmatpush3.bf16.msra.mxu0 %v1639_v6 }
  0x8f   : > { %1461 = vmatprep.subr.bf16.mxu0 %v1770_v20 }
  0x92   : > { %1462 = vmatpush3.bf16.msra.mxu0 %v1640_v7 }
  0x93   : > { %1463 = vmatprep.subr.bf16.mxu0 %v1770_v20 }
  0x96   : > { %1464 = vmatpush3.bf16.msra.mxu0 %v1641_v8 }
  0x97   : > { %1465 = vmatprep.subr.bf16.mxu0 %v1770_v20 }
  0x9a   : > { %1466 = vmatpush3.bf16.msra.mxu0 %v1642_v30 }
  0x9b   : > { %1467 = vmatprep.subr.bf16.mxu0 %v1770_v20 }
  0x9e   : > { %1468 = vmatpush3.bf16.msra.mxu0 %v1643_v31 }
  0x9f   : > { %1469 = vmatprep.subr.bf16.mxu0 %v1770_v20 }
  0xa2   : > { %1470 = vmatpush3.bf16.msra.mxu0 %v1644_v32 }
  0xa3   : > { %1471 = vmatprep.subr.bf16.mxu0 %v1770_v20 }
  0xa6   : > { %1472 = vmatpush3.bf16.msra.mxu0 %v1645_v33 }
  0xa7   : > { %1473 = vmatprep.subr.bf16.mxu0 %v1770_v20 }
  0xaa   : > { %1474 = vmatpush3.bf16.msra.mxu0 %v1646_v34 }
 0x143   : > { %v760_v11 = vpop.f32.mrb[0].mxu1 }
 0x144   : > { %v1437_v12 = vpop.f32.mrb[1].mxu1 }
 0x145   : > { %v763_v13 = vpop.f32.mrb[2].mxu1 }
 0x146   : > { %v1438_v14 = vpop.f32.mrb[3].mxu1 }
 0x160   : > { %v908_v18 = vpop.f32.mrb[0].mxu0 }
 0x161   : > { %v909_v19 = vadd.f32 %v908_v18, %v787_v17  ;;  %v910_v21 = vpop.f32.mrb[1].mxu0 }
 0x162   : > { %v912_v22 = vpop.f32.mrb[2].mxu0  ;;  %v911_v37 = vadd.f32 %v910_v21, %v791_v36 }
 0x163   : > { %v1366_v23 = vmul.f32 -1.442695, %v909_v19  ;;  %v913_v24 = vpop.f32.mrb[3].mxu0 }
 0x164   : > { %v1367_v38 = vmul.f32 -1.442695, %v911_v37 }
 0x165   : > { %1647 = vpow2.f32 %v1366_v23 }
 0x16f   : > { %v1648_v25 = vpop.eup %1647 }
 0x170   : > { %v919_v26 = vadd.f32 1.0, %v1648_v25 }
 0x172   : > { %1649 = vrcp.f32 %v919_v26 }
 0x173   : > { %1651 = vpow2.f32 %v1367_v38 }
 0x17c   : > { %v1650_v27 = vpop.eup %1649 }
 0x17d   : > { %v929_v28 = vmul.f32 %v1650_v27, %v2114_v60  ;;  %v1652_v39 = vpop.eup %1651 }
 0x17e   : > { %v926_v40 = vadd.f32 1.0, %v1652_v39 }
 0x17f   : > { %v930_v29 = vpack.c.bf16 %v929_v28, %v929_v28 }
 0x180   : > { %1653 = vrcp.f32 %v926_v40 }
 0x181   : > { %1456 = vmatmul.mubr.bf16.vlgmr.msra.gmra.mrb[4].mxu1 %v930_v29 }
 0x18a   : > { %v1654_v47 = vpop.eup %1653 }
 0x18b   : > { %v1045_v48 = vsub.f32 1.0, %v1654_v47 }
 0x18d   : > { %v1046_v50 = vmul.f32 %v1045_v48, %v2114_v60 }
 0x254   : > { %v1029_v41 = vpop.f32.mrb[4].mxu1 }
 0x255   : > { %v1035_v43 = vadd.f32 %v1029_v41, %v760_v11  ;;  %v1457_v44 = vpop.f32.mrb[5].mxu1 }
 0x256   : > { %v1032_v45 = vpop.f32.mrb[6].mxu1 }
 0x257   : > { %v1043_v46 = vadd.f32 %v1376_v42, %v1035_v43  ;;  %v1458_v20 = vpop.f32.mrb[7].mxu1 }
 0x259   : > { %1655 = vtanh.f32 %v1043_v46 }
 0x263   : > { %v1656_v49 = vpop.eup %1655 }
 0x264   : > { %v1047_v51 = vmul.f32 %v1656_v49, %v1654_v47 }
 0x266   : > { %v1048_v52 = vadd.f32 %v1047_v51, %v1046_v50 }
 0x268   : > { %1049 = vst [vmem:[#allocation2] sm:$0xff] %v1048_v52  ;;  %v1050_v53 = vpack.c.bf16 %v1048_v52, %v1048_v52  ;;  %1167 = vst [vmem:[%s1971_s23] sm:$0xff] (!%p1386_p6), %v1048_v52 }
 0x26a   : > { %1476 = vmatmul.mubr.bf16.vlgmr.msra.gmra.mrb[4].mxu0 %v1050_v53 }
 0x33a   : > { %1166 = sbr.rel (%p1386_p6) target bundleno = 833 (0x341), region = 105 }
 0x33d   : > { %v1156_v55 = vpop.f32.mrb[4].mxu0 }
 0x33e   : > { %v1157_v56 = vadd.f32 %v1377_v54, %v1156_v55  ;;  %v1477_v57 = vpop.f32.mrb[5].mxu0 }
 0x33f   : > { %v1159_v58 = vpop.f32.mrb[6].mxu0 }
 0x340   : > { %1162 = vst [vmem:[%s497_s6] sm:$0xff] %v1157_v56  ;;  %v1478_v59 = vpop.f32.mrb[7].mxu0 }
 0x341 PF: > { %s1388_s29 = sshll.u32 %s1751_s18, 1  ;;  %s1188_s16 = sshll.u32 %s497_s6, 4  ;;  %s2188_s16 = int_to_ptr.vmem [resolvable:$true] %s1188_s16 }
 0x342   : > { %s1184_s26 = sadd.s32 %s1755_s19, %s1388_s29  ;;  %s2282_s21 = sld [smem:[#allocation18_spill]] }
 0x343   : > { %s1389_s7 = sshll.u32 %s1184_s26, 7  ;;  %s2284_s27 = sand.u32 1, %s1735_s14  }
 0x344   : > { %s1169_s17 = scalar_lea.sflag [#allocation5], %s2284_s27  ;;  %s1657_s25 = scalar_lea.vmem %s2188_s16, 128 }
 0x345   : > { %p1658_p8 = scmp.ne.s32.totalorder %s2188_s16, %s1657_s25  ;;  %s1772_s18 = smov [#allocation4]  }
 0x346   : > { %s1661_s19 = sshll.u32 %s1772_s18, 4  ;;  %s1662_s19 = int_to_ptr.vmem [resolvable:$false] %s1661_s19 }
 0x347   : > { %p1659_p9 = pnand %p1658_p8, %p1900_p7  ;;  %s1663_s6 = scalar_lea.vmem %s1662_s19, 256 }
 0x348   : > { %s2283_s9 = smov %s2282_s21  ;;  %s1186_s23 = scalar_lea.hbm %s2282_s21, %s1389_s7 }
 0x349   : > { %p1660_p10 = pneg %p1659_p9  ;;  %p1664_p11 = scmp.lt.s32.totalorder %s2188_s16, %s1662_s19 }
 0x34a   : > { %p1665_p13 = scmp.lt.s32.totalorder %s1663_s6, %s1657_s25 }
 0x34c   : > { %p1666_p0 = por %p1665_p13, %p1664_p11 }
 0x34e   : > { %p1667_p1 = pnand %p1666_p0, %p1660_p10 }
 0x350   : > { %1670 = shalt.err (!%p1667_p1)
}
 0x351   : > { %s1671_s30 = scalar_lea.hbm %s1186_s23, 128  ;;  %s1675_s20 = scalar_lea.hbm %s2283_s9, 2048 }
 0x352   : > { %p1672_p2 = scmp.ne.s32.totalorder %s1186_s23, %s1671_s30  ;;  %p1676_p5 = scmp.lt.u32.totalorder %s1186_s23, %s2283_s9 }
 0x353   : > { %p1677_p6 = scmp.lt.u32.totalorder %s1675_s20, %s1671_s30  ;;  %p1679_p9 = scmp.lt.u32.totalorder %s1671_s30, %s1186_s23 }
 0x354   : > { %p1673_p3 = pnand %p1672_p2, %p1900_p7 }
 0x355   : > { %p1678_p8 = por %p1677_p6, %p1676_p5 }
 0x356   : > { %p1674_p4 = pneg %p1673_p3 }
 0x357   : > { %p1680_p11 = por %p1679_p9, %p1678_p8 }
 0x359   : > { %p1681_p10 = pnand %p1680_p11, %p1674_p4 }
 0x35b   : > { %1684 = shalt.err (!%p1681_p10)
}
 0x35c   : > { %1485 = dma.vmem_to_hbm [thread:$0]  (%p1900_p7), %s2188_s16, 128, %s1186_s23, %s1169_s17  }
 0x35d PF: > { %p1491_p13 = scmp.ge.s32.totalorder %s1767_s22, 2  ;;  %s1203_s24 = sand.u32 1, %s1731_s13  }
 0x35e   : > { %s1204_s12 = scalar_lea.sflag [#allocation5], %s1203_s24 }
 0x35f   : > { %p1488_p0 = pnand %p1491_p13, %p1908_p12 }
 0x361   : > { %1726 = dma.done.wait (!%p1488_p0), %s1204_s12, 128  }
 0x362   : > { %1728 = vsyncadd (!%p1488_p0), %s1204_s12, 4294967168  ;;  %s24_s22 = sadd.s32 1, %s1767_s22   ;;  %s2286_s21 = sld [smem:[#allocation7_spill]] }
 0x363   : > { %p21_p1 = scmp.ge.s32.totalorder %s24_s22, 18   ;;  %s2287_s15 = sld [smem:[#allocation15_spill]] }
 0x364   : > { %s2288_s16 = sld [smem:[#allocation8_spill]]  ;;  %s2289_s17 = sld [smem:[#allocation14_spill]] }
 0x365   : > { %s2290_s18 = sld [smem:[#allocation9_spill]]  ;;  %s2291_s19 = sld [smem:[#allocation10_spill]] }
 0x366   : > { %s2292_s20 = sld [smem:[#allocation11_spill]]  ;;  %s2293_s11 = sld [smem:[#allocation12_spill]] }
 0x367   : > { %s2294_s13 = smov %s1735_s14  ;;  %23 = sbr.rel (!%p21_p1) target bundleno = 10 (0xa), region = 163 }
 0x368   : > { %s2295_s14 = smov %s2286_s21 }
 0x36c   : > { %s2296_s21 = smov %s2293_s11 }
 0x36e   :  { %1216 = vsyncpa [#allocation5], 1 }
 0x36f   :  { %1218 = vsyncpa [#allocation5 + $0x1], 1 }

</bundles_post_ra>
